<compile_context>
chip_gen: v5e
topology: v5e:2x2
jax: 0.10.0
libtpu: 0.0.40
codegen_flags: <defaults>
</compile_context>

<pallas_src>
import functools

import jax
import jax.numpy as jnp
from jax.experimental import pallas as pl
from jax.experimental.pallas import tpu as pltpu

BN_EPS = 1e-5
MAX_LANE_TILE = 2048                 # spatial elements per tile (lane axis)
VMEM_LIMIT_BYTES = 48 * 1024 * 1024  # safe on v5e/v6e (128 MiB) and v7x (64 MiB)


def _pick_tile(hw, max_tile=MAX_LANE_TILE):
    """Largest multiple of 128 that divides hw and is <= max_tile (else hw)."""
    if hw % 128 != 0:
        return hw
    t = min(hw, max_tile)
    t = (t // 128) * 128
    while hw % t != 0:
        t -= 128
    return t


def _stats_kernel(x_ref, gamma_ref, beta_ref, scale_ref, shift_ref,
                  sum_ref, sumsq_ref, *, count):
    """Pass 1: accumulate per-channel sum / sumsq, fold BN affine at the end.

    x_ref:                (1, C_in, T)   activation tile (spatial on lanes)
    gamma_ref, beta_ref:  (C_in, 1)      BN affine parameters (resident)
    scale_ref, shift_ref: (C_in, 1)      outputs: folded scale/shift
    sum_ref, sumsq_ref:   (C_in, 1)      VMEM scratch accumulators
    """
    n_i, t_i = pl.program_id(0), pl.program_id(1)

    @pl.when((n_i == 0) & (t_i == 0))
    def _():
        sum_ref[...] = jnp.zeros_like(sum_ref)
        sumsq_ref[...] = jnp.zeros_like(sumsq_ref)

    x = x_ref[0].astype(jnp.float32)                    # (C_in, T)
    sum_ref[...] += jnp.sum(x, axis=-1, keepdims=True)
    sumsq_ref[...] += jnp.sum(x * x, axis=-1, keepdims=True)

    @pl.when((n_i == pl.num_programs(0) - 1) & (t_i == pl.num_programs(1) - 1))
    def _():
        inv_count = 1.0 / count
        mean = sum_ref[...] * inv_count
        var = sumsq_ref[...] * inv_count - mean * mean   # biased variance
        inv_std = jax.lax.rsqrt(var + BN_EPS)
        a = gamma_ref[...].astype(jnp.float32) * inv_std
        scale_ref[...] = a
        shift_ref[...] = beta_ref[...].astype(jnp.float32) - mean * a


def _bn_relu_conv_kernel(x_ref, scale_ref, shift_ref, w_ref, b_ref, o_ref):
    """Pass 2: normalize + ReLU + 1x1 conv as (C_out,C_in)@(C_in,T) matmul.

    x_ref: (1, C_in, T); scale/shift: (C_in, 1); w_ref: (C_out, C_in);
    b_ref: (C_out, 1); o_ref: (1, C_out, T)  (lane-dense output tile)
    """
    x = x_ref[0].astype(jnp.float32)                    # (C_in, T)
    y = jnp.maximum(x * scale_ref[...] + shift_ref[...], 0.0)
    # BN math forces f32 activations; matmul accumulates in f32 on the MXU.
    out = jnp.dot(w_ref[...].astype(jnp.float32), y,
                  preferred_element_type=jnp.float32)   # (C_out, T)
    out = out + b_ref[...]
    o_ref[0] = out.astype(o_ref.dtype)


def bn_relu_conv1(x_nchw, gamma, beta, conv_w, conv_b):
    """x_nchw: (N, C_in, H, W); conv_w: (C_out, C_in, 1, 1); conv_b: (C_out,)."""
    n, c_in, h, w = x_nchw.shape
    c_out = conv_w.shape[0]
    hw = h * w

    x3d = x_nchw.reshape(n, c_in, hw)       # free view, no transpose
    gamma2 = gamma.reshape(c_in, 1)
    beta2 = beta.reshape(c_in, 1)
    w2d = conv_w.reshape(c_out, c_in)
    b2d = conv_b.reshape(c_out, 1)

    t = _pick_tile(hw)
    n_t = hw // t
    count = n * hw

    # ---- Pass 1: global per-channel BN statistics -> folded scale/shift ----
    scale, shift = pl.pallas_call(
        functools.partial(_stats_kernel, count=count),
        out_shape=(jax.ShapeDtypeStruct((c_in, 1), jnp.float32),
                   jax.ShapeDtypeStruct((c_in, 1), jnp.float32)),
        grid_spec=pltpu.PrefetchScalarGridSpec(
            num_scalar_prefetch=0,
            grid=(n, n_t),
            in_specs=[
                pl.BlockSpec((1, c_in, t), lambda i, j: (i, 0, j)),
                pl.BlockSpec((c_in, 1), lambda i, j: (0, 0)),
                pl.BlockSpec((c_in, 1), lambda i, j: (0, 0)),
            ],
            out_specs=[
                pl.BlockSpec((c_in, 1), lambda i, j: (0, 0)),
                pl.BlockSpec((c_in, 1), lambda i, j: (0, 0)),
            ],
            scratch_shapes=[pltpu.VMEM((c_in, 1), jnp.float32),
                            pltpu.VMEM((c_in, 1), jnp.float32)],
        ),
        compiler_params=pltpu.CompilerParams(
            dimension_semantics=("arbitrary", "arbitrary"),
            vmem_limit_bytes=VMEM_LIMIT_BYTES),
    )(x3d, gamma2, beta2)

    # ---- Pass 2: normalize + ReLU + 1x1 conv, lane-dense tiled output ----
    out3d = pl.pallas_call(
        _bn_relu_conv_kernel,
        out_shape=jax.ShapeDtypeStruct((n, c_out, hw), x_nchw.dtype),
        grid_spec=pltpu.PrefetchScalarGridSpec(
            num_scalar_prefetch=0,
            grid=(n, n_t),
            in_specs=[
                pl.BlockSpec((1, c_in, t), lambda i, j: (i, 0, j)),
                pl.BlockSpec((c_in, 1), lambda i, j: (0, 0)),
                pl.BlockSpec((c_in, 1), lambda i, j: (0, 0)),
                pl.BlockSpec((c_out, c_in), lambda i, j: (0, 0)),
                pl.BlockSpec((c_out, 1), lambda i, j: (0, 0)),
            ],
            out_specs=pl.BlockSpec((1, c_out, t), lambda i, j: (i, 0, j)),
        ),
        compiler_params=pltpu.CompilerParams(
            dimension_semantics=("parallel", "parallel"),
            vmem_limit_bytes=VMEM_LIMIT_BYTES),
    )(x3d, scale, shift, w2d, b2d)

    return out3d.reshape(n, c_out, h, w)    # free view, no transpose


def _reference(x_nchw, gamma, beta, conv_w, conv_b):
    # pure-JAX reference for sanity check (training-mode batch stats)
    mean = jnp.mean(x_nchw, axis=(0, 2, 3), keepdims=True)
    var = jnp.mean((x_nchw - mean) ** 2, axis=(0, 2, 3), keepdims=True)
    y = (x_nchw - mean) / jnp.sqrt(var + BN_EPS)
    y = y * gamma.reshape(1, -1, 1, 1) + beta.reshape(1, -1, 1, 1)
    y = jnp.maximum(y, 0.0)
    out = jnp.einsum('nchw,oc->nohw', y, conv_w.reshape(conv_w.shape[0], -1))
    return out + conv_b.reshape(1, -1, 1, 1)


if __name__ == "__main__":
    key = jax.random.PRNGKey(0)
    k_x, k_w, k_b = jax.random.split(key, 3)

    N, C_IN, C_OUT, H, W = 2, 4, 8, 16, 16

    x = jax.random.normal(k_x, (N, C_IN, H, W), dtype=jnp.float32)

    # Deterministic parameter init (shapes per nn.BatchNorm2d / nn.Conv2d k=1)
    gamma = jnp.ones((C_IN,), dtype=jnp.float32)     # BN weight
    beta = jnp.zeros((C_IN,), dtype=jnp.float32)     # BN bias
    fan_in = C_IN  # kernel_size=1
    bound = 1.0 / (fan_in ** 0.5)
    conv_w = jax.random.uniform(k_w, (C_OUT, C_IN, 1, 1),
                                minval=-bound, maxval=bound, dtype=jnp.float32)
    conv_b = jax.random.uniform(k_b, (C_OUT,),
                                minval=-bound, maxval=bound, dtype=jnp.float32)

    out = bn_relu_conv1(x, gamma, beta, conv_w, conv_b)
    out = jax.block_until_ready(out)

    ref = _reference(x, gamma, beta, conv_w, conv_b)
    assert out.shape == (N, C_OUT, H, W)
    assert jnp.allclose(out, ref, atol=1e-4, rtol=1e-4)

    print("KERNEL_OK")
</pallas_src>

<mosaic_0001>
module attributes {stable_mosaic.version = 11 : i64} {
  func.func @_stats_kernel(%arg0: i32, %arg1: i32, %arg2: memref<1x4x256xf32, #tpu.memory_space<vmem>>, %arg3: memref<4x1xf32, #tpu.memory_space<vmem>>, %arg4: memref<4x1xf32, #tpu.memory_space<vmem>>, %arg5: memref<4x1xf32, #tpu.memory_space<vmem>>, %arg6: memref<4x1xf32, #tpu.memory_space<vmem>>, %arg7: memref<4x1xf32, #tpu.memory_space<vmem>>, %arg8: memref<4x1xf32, #tpu.memory_space<vmem>>) attributes {dimension_semantics = [#tpu.dimension_semantics<arbitrary>, #tpu.dimension_semantics<arbitrary>], iteration_bounds = array<i64: 2, 1>, scalar_prefetch = 0 : i64, scratch_operands = 2 : i64, tpu.core_type = #tpu.core_type<tc>, window_params = [{transform_indices = @transform_0, window_bounds = array<i64: 1, 4, 256>}, {pipeline_mode = #tpu.pipeline_mode<synchronous>, transform_indices = @transform_1, window_bounds = array<i64: 4, 1>}, {pipeline_mode = #tpu.pipeline_mode<synchronous>, transform_indices = @transform_2, window_bounds = array<i64: 4, 1>}, {pipeline_mode = #tpu.pipeline_mode<synchronous>, transform_indices = @transform_3, window_bounds = array<i64: 4, 1>}, {pipeline_mode = #tpu.pipeline_mode<synchronous>, transform_indices = @transform_4, window_bounds = array<i64: 4, 1>}]} {
    %c0_i32 = arith.constant 0 : i32
    %0 = arith.cmpi eq, %arg0, %c0_i32 : i32
    %c0_i32_0 = arith.constant 0 : i32
    %1 = arith.cmpi eq, %arg1, %c0_i32_0 : i32
    %2 = arith.andi %0, %1 : i1
    %3 = arith.extui %2 : i1 to i32
    %c0_i32_1 = arith.constant 0 : i32
    %4 = arith.cmpi ne, %3, %c0_i32_1 : i32
    scf.if %4 {
      %cst_15 = arith.constant 0.000000e+00 : f32
      %23 = vector.broadcast %cst_15 : f32 to vector<4x1xf32>
      %c0_16 = arith.constant 0 : index
      %c0_17 = arith.constant 0 : index
      %24 = vector.load %arg7[%c0_16, %c0_17] : memref<4x1xf32, #tpu.memory_space<vmem>>, vector<4x1xf32>
      tpu.vector_store %arg7[%c0_16, %c0_17], %23 {strides = array<i32>} : memref<4x1xf32, #tpu.memory_space<vmem>>, vector<4x1xf32>,
      %cst_18 = arith.constant 0.000000e+00 : f32
      %25 = vector.broadcast %cst_18 : f32 to vector<4x1xf32>
      %c0_19 = arith.constant 0 : index
      %c0_20 = arith.constant 0 : index
      %26 = vector.load %arg8[%c0_19, %c0_20] : memref<4x1xf32, #tpu.memory_space<vmem>>, vector<4x1xf32>
      tpu.vector_store %arg8[%c0_19, %c0_20], %25 {strides = array<i32>} : memref<4x1xf32, #tpu.memory_space<vmem>>, vector<4x1xf32>,
    } else {
    }
    %c0 = arith.constant 0 : index
    %c0_2 = arith.constant 0 : index
    %c0_3 = arith.constant 0 : index
    %5 = vector.load %arg2[%c0, %c0_2, %c0_3] : memref<1x4x256xf32, #tpu.memory_space<vmem>>, vector<1x4x256xf32>
    %6 = vector.shape_cast %5 : vector<1x4x256xf32> to vector<4x256xf32>
    %c0_4 = arith.constant 0 : index
    %c0_5 = arith.constant 0 : index
    %7 = vector.load %arg7[%c0_4, %c0_5] : memref<4x1xf32, #tpu.memory_space<vmem>>, vector<4x1xf32>
    %cst = arith.constant dense<0.000000e+00> : vector<4xf32>
    %8 = vector.multi_reduction <add>, %6, %cst [1] : vector<4x256xf32> to vector<4xf32>
    %9 = vector.shape_cast %8 : vector<4xf32> to vector<4x1xf32>
    %10 = arith.addf %7, %9 : vector<4x1xf32>
    %c0_6 = arith.constant 0 : index
    %c0_7 = arith.constant 0 : index
    %11 = vector.load %arg7[%c0_6, %c0_7] : memref<4x1xf32, #tpu.memory_space<vmem>>, vector<4x1xf32>
    tpu.vector_store %arg7[%c0_6, %c0_7], %10 {strides = array<i32>} : memref<4x1xf32, #tpu.memory_space<vmem>>, vector<4x1xf32>,
    %c0_8 = arith.constant 0 : index
    %c0_9 = arith.constant 0 : index
    %12 = vector.load %arg8[%c0_8, %c0_9] : memref<4x1xf32, #tpu.memory_space<vmem>>, vector<4x1xf32>
    %13 = arith.mulf %6, %6 : vector<4x256xf32>
    %cst_10 = arith.constant dense<0.000000e+00> : vector<4xf32>
    %14 = vector.multi_reduction <add>, %13, %cst_10 [1] : vector<4x256xf32> to vector<4xf32>
    %15 = vector.shape_cast %14 : vector<4xf32> to vector<4x1xf32>
    %16 = arith.addf %12, %15 : vector<4x1xf32>
    %c0_11 = arith.constant 0 : index
    %c0_12 = arith.constant 0 : index
    %17 = vector.load %arg8[%c0_11, %c0_12] : memref<4x1xf32, #tpu.memory_space<vmem>>, vector<4x1xf32>
    tpu.vector_store %arg8[%c0_11, %c0_12], %16 {strides = array<i32>} : memref<4x1xf32, #tpu.memory_space<vmem>>, vector<4x1xf32>,
    %c1_i32 = arith.constant 1 : i32
    %18 = arith.cmpi eq, %arg0, %c1_i32 : i32
    %c0_i32_13 = arith.constant 0 : i32
    %19 = arith.cmpi eq, %arg1, %c0_i32_13 : i32
    %20 = arith.andi %18, %19 : i1
    %21 = arith.extui %20 : i1 to i32
    %c0_i32_14 = arith.constant 0 : i32
    %22 = arith.cmpi ne, %21, %c0_i32_14 : i32
    scf.if %22 {
      %c0_15 = arith.constant 0 : index
      %c0_16 = arith.constant 0 : index
      %23 = vector.load %arg7[%c0_15, %c0_16] : memref<4x1xf32, #tpu.memory_space<vmem>>, vector<4x1xf32>
      %cst_17 = arith.constant 0.001953125 : f32
      %24 = vector.broadcast %cst_17 : f32 to vector<4x1xf32>
      %25 = arith.mulf %23, %24 : vector<4x1xf32>
      %c0_18 = arith.constant 0 : index
      %c0_19 = arith.constant 0 : index
      %26 = vector.load %arg8[%c0_18, %c0_19] : memref<4x1xf32, #tpu.memory_space<vmem>>, vector<4x1xf32>
      %cst_20 = arith.constant 0.001953125 : f32
      %27 = vector.broadcast %cst_20 : f32 to vector<4x1xf32>
      %28 = arith.mulf %26, %27 : vector<4x1xf32>
      %29 = arith.mulf %25, %25 : vector<4x1xf32>
      %30 = arith.subf %28, %29 : vector<4x1xf32>
      %cst_21 = arith.constant 9.99999974E-6 : f32
      %31 = vector.broadcast %cst_21 : f32 to vector<4x1xf32>
      %32 = arith.addf %30, %31 : vector<4x1xf32>
      %33 = math.rsqrt %32 : vector<4x1xf32>
      %c0_22 = arith.constant 0 : index
      %c0_23 = arith.constant 0 : index
      %34 = vector.load %arg3[%c0_22, %c0_23] : memref<4x1xf32, #tpu.memory_space<vmem>>, vector<4x1xf32>
      %35 = arith.mulf %34, %33 : vector<4x1xf32>
      %c0_24 = arith.constant 0 : index
      %c0_25 = arith.constant 0 : index
      %36 = vector.load %arg5[%c0_24, %c0_25] : memref<4x1xf32, #tpu.memory_space<vmem>>, vector<4x1xf32>
      tpu.vector_store %arg5[%c0_24, %c0_25], %35 {strides = array<i32>} : memref<4x1xf32, #tpu.memory_space<vmem>>, vector<4x1xf32>,
      %c0_26 = arith.constant 0 : index
      %c0_27 = arith.constant 0 : index
      %37 = vector.load %arg4[%c0_26, %c0_27] : memref<4x1xf32, #tpu.memory_space<vmem>>, vector<4x1xf32>
      %38 = arith.mulf %25, %35 : vector<4x1xf32>
      %39 = arith.subf %37, %38 : vector<4x1xf32>
      %c0_28 = arith.constant 0 : index
      %c0_29 = arith.constant 0 : index
      %40 = vector.load %arg6[%c0_28, %c0_29] : memref<4x1xf32, #tpu.memory_space<vmem>>, vector<4x1xf32>
      tpu.vector_store %arg6[%c0_28, %c0_29], %39 {strides = array<i32>} : memref<4x1xf32, #tpu.memory_space<vmem>>, vector<4x1xf32>,
    } else {
    }
    return
  }
  func.func @transform_0(%arg0: i32, %arg1: i32) -> (i32, i32, i32) {
    %c0_i32 = arith.constant 0 : i32
    %c0_i32_0 = arith.constant 0 : i32
    return %arg0, %c0_i32, %arg1 : i32, i32, i32
  }
  func.func @transform_1(%arg0: i32, %arg1: i32) -> (i32, i32) {
    %c0_i32 = arith.constant 0 : i32
    %c0_i32_0 = arith.constant 0 : i32
    %c0_i32_1 = arith.constant 0 : i32
    return %c0_i32, %c0_i32_0 : i32, i32
  }
  func.func @transform_2(%arg0: i32, %arg1: i32) -> (i32, i32) {
    %c0_i32 = arith.constant 0 : i32
    %c0_i32_0 = arith.constant 0 : i32
    %c0_i32_1 = arith.constant 0 : i32
    return %c0_i32, %c0_i32_0 : i32, i32
  }
  func.func @transform_3(%arg0: i32, %arg1: i32) -> (i32, i32) {
    %c0_i32 = arith.constant 0 : i32
    %c0_i32_0 = arith.constant 0 : i32
    %c0_i32_1 = arith.constant 0 : i32
    return %c0_i32, %c0_i32_0 : i32, i32
  }
  func.func @transform_4(%arg0: i32, %arg1: i32) -> (i32, i32) {
    %c0_i32 = arith.constant 0 : i32
    %c0_i32_0 = arith.constant 0 : i32
    %c0_i32_1 = arith.constant 0 : i32
    return %c0_i32, %c0_i32_0 : i32, i32
  }
}

</mosaic_0001>

<bundles_post_ra>
// kernel: tpu_custom_call.1
= control target key start
LH: loop header
LB: loop body
LE: loop exit
PB: predicated region body
PF: predicated region fallthrough
CT: control target
= control target key end

     0   :  { %10 = vsyncpa [#allocation5], 0  ;;  %s629_s0 = inlined_call_operand.hbm [shape: f32[2,4,256], index: 0, kind: input, shape index: {}]   ;;  %s630_s1 = inlined_call_operand.vmem [shape: f32[4,1], index: 1, kind: input, shape index: {}]   ;;  %s631_s2 = inlined_call_operand.vmem [shape: f32[4,1], index: 2, kind: input, shape index: {}]   ;;  %s632_s3 = inlined_call_operand.vmem [shape: f32[4,1], index: 3, kind: output, shape index: {0}]   ;;  %s633_s4 = inlined_call_operand.vmem [shape: f32[4,1], index: 4, kind: output, shape index: {1}]  }
   0x1   :  { %12 = vsyncpa [#allocation5 + $0x1], 0  ;;  %s526_s15 = smov 0   ;;  %s528_s16 = smov 0  }
   0x2   :  { %s530_s17 = smov 0   ;;  %s532_s18 = smov 0  }
   0x3   :  { %s534_s19 = smov 0   ;;  %s536_s20 = smov 0  }
   0x4 LB: > { %s345_s21 = sadd.s32 4294967295, %s498_s20   ;;  %s30_s22 = sadd.s32 1, %s494_s19  ;;  %s498_s20 = sphi %s536_s20, %s18_s20   ;;  %s494_s19 = sphi %s534_s19, %s640_s19   ;;  %s490_s18 = sphi %s532_s18, %s639_s18   ;;  %s486_s17 = sphi %s530_s17, %s638_s17   ;;  %s482_s16 = sphi %s528_s16, %s637_s16   ;;  %s478_s15 = sphi %s526_s15, %s636_s15  }
   0x5   : > { %p32_p0 = scmp.ge.s32.totalorder %s30_s22, 2  ;;  %s39_s23 = sadd.s32 1, %s486_s17 }
   0x6   : > { %p46_p1 = scmp.ne.s32.totalorder %s486_s17, %s482_s16  ;;  %p47_p2 = scmp.eq.s32.totalorder %s498_s20, 0 }
   0x7   : > { %s642_s22 = smov (%p32_p0, %s30_s22), 0  ;;  %p52_p4 = scmp.ne.s32.totalorder %s482_s16, %s478_s15 }
   0x8   : > { %p562_p3 = por %p47_p2, %p46_p1  ;;  %s34_s25 = ssub.s32 %s494_s19, %s642_s22 }
   0x9   : > { %p53_p5 = scmp.eq.s32.totalorder %s345_s21, 0  ;;  %p37_p6 = scmp.eq.s32.totalorder %s34_s25, 0 }
   0xa   : > { %p366_p8 = scmp.lt.s32.totalorder %s498_s20, 2  ;;  %s166_s28 = sand.u32 1, %s486_s17  }
   0xb   : > { %p569_p7 = por %p53_p5, %p52_p4  ;;  %s357_s29 = sshll.u32 %s494_s19, 3 }
   0xc   : > { %s575_s27 = scalar_select %p37_p6, %s486_s17, %s39_s23  }
   0xd   : > { %s348_s30 = sshll.u32 %s166_s28, 3  ;;  %s177_s7 = scalar_lea.hbm %s629_s0, %s357_s29 }
   0xe   : > { %s179_s8 = sshll.u32 %s177_s7, 4  ;;  %s170_s9 = scalar_lea.vmem [#allocation4], %s348_s30  ;;  %s180_s8 = int_to_ptr.hbm [resolvable:$true] %s179_s8 }
   0xf   : > { %s181_s10 = sshll.u32 %s170_s9, 4  ;;  %p363_p9 = pnand %p366_p8, %p562_p3  ;;  %s182_s10 = int_to_ptr.vmem [resolvable:$true] %s181_s10 }
  0x10   : > { %p351_p10 = scmp.ge.s32.totalorder %s498_s20, 1  ;;  %p186_p11 = scmp.lt.s32.totalorder %s498_s20, 3 }
  0x11   : > { %s167_s11 = scalar_lea.sflag [#allocation5], %s166_s28 }
  0x12   : > { %365 = dma.hbm_to_vmem [thread:$0]  (!%p363_p9), %s180_s8, 128, %s182_s10, %s167_s11  }
  0x13   : > { %p187_p12 = pnand %p351_p10, %p186_p11 }
  0x14   : > { %s192_s12 = sand.u32 (!%p187_p12), 1, %s482_s16  }
  0x15   : > { %190 = sbr.rel (%p187_p12) target bundleno = 211 (0xd3), region = 32  ;;  %s352_s13 = sshll.u32 (!%p187_p12), %s192_s12, 3 }
  0x16   : > { %s193_s14 = scalar_lea.sflag (!%p187_p12), [#allocation5], %s192_s12  ;;  %s196_s15 = scalar_lea.vmem (!%p187_p12), [#allocation4], %s352_s13 }
  0x1a   : > { %473 = dma.done.wait (%p569_p7), %s193_s14, 128  }
  0x1b   : > { %475 = vsyncadd (%p569_p7), %s193_s14, 4294967168  ;;  %p218_p13 = scmp.eq.s32.totalorder %s490_s18, 0 }
  0x1c   : > { %vm224_vm0 = vcmask (%p218_p13), 3072   ;;  %v500_v0 = vmov (%p218_p13), 0.0  }
  0x1d   : > { %223 = sbr.rel (!%p218_p13) target bundleno = 34 (0x22), region = 40  ;;  %225 = vst.msk [vmem:[#allocation2] sm:$0xf] (%p218_p13), %vm224_vm0, %v500_v0 }
  0x1e   : > { %226 = vst.msk [vmem:[#allocation3] sm:$0xf] (%p218_p13), %vm224_vm0, %v500_v0 }
  0x22 PF: > { %v227_v1 = vld [vmem:[%s196_s15] sm:$0xff]  ;;  %vm235_vm1 = vcmask 1043456   ;;  %p259_p0 = scmp.eq.s32.totalorder %s490_s18, 1  ;;  %vm242_vm2 = vcmask 3072  }
  0x23   : > { %230 = vst [vmem:[#allocation1] ss:$2 sm:$0xff] %v227_v1  ;;  %v245_v2 = vmul.f32 %v227_v1, %v227_v1  ;;  %v281_v32 = vld [vmem:[%s630_s1] sm:$0xf] (%p259_p0) }
  0x24   : > { %v228_v13 = vld [vmem:[#allocation2] sm:$0xf]  ;;  %v284_v35 = vld [vmem:[%s631_s2] sm:$0xf] (%p259_p0) }
  0x25   : > { %v244_v16 = vld [vmem:[#allocation3] sm:$0xf] }
  0x2a   : > { %v231_v3 = vld.sshfl [vmem:[#allocation1] sm:$0xff pattern:$0x75316420]  ;;  %v232_v4 = vld.sshfl [vmem:[#allocation1 + $0x8] sm:$0xff pattern:$0x75316420] }
  0x2b   : > { %v236_v5 = vsel %vm235_vm1, %v231_v3, 0.0  ;;  %v237_v6 = vsel %vm235_vm1, %v232_v4, 0.0  ;;  %247 = vst [vmem:[#allocation1] ss:$2 sm:$0xff] %v245_v2 }
  0x2c   : > { %v238_v7 = vadd.f32 %v237_v6, %v236_v5 }
  0x2e   : > { %239 = vadd.xlane.f32.xlu0 %v238_v7 }
  0x32   : > { %v248_v8 = vld.sshfl [vmem:[#allocation1] sm:$0xff pattern:$0x75316420]  ;;  %v249_v9 = vld.sshfl [vmem:[#allocation1 + $0x8] sm:$0xff pattern:$0x75316420] }
  0x33   : > { %v252_v10 = vsel %vm235_vm1, %v248_v8, 0.0  ;;  %v253_v11 = vsel %vm235_vm1, %v249_v9, 0.0 }
  0x34   : > { %v254_v12 = vadd.f32 %v253_v11, %v252_v10 }
  0x36   : > { %255 = vadd.xlane.f32.xlu0 %v254_v12 }
  0xa1   : > { %v240_v14 = vpop.xlane.xlu0 %239 }
  0xa2   : > { %v241_v15 = vadd.f32 %v240_v14, %v228_v13 }
  0xa4   : > { %243 = vst.msk [vmem:[#allocation2] sm:$0xf] %vm242_vm2, %v241_v15 }
  0xa8   : > { %263 = sbr.rel (!%p259_p0) target bundleno = 211 (0xd3), region = 44 }
  0xa9   : > { %v256_v17 = vpop.xlane.xlu0 %255 }
  0xaa   : > { %v257_v18 = vadd.f32 %v256_v17, %v244_v16 }
  0xab   : > { %v264_v19 = vld [vmem:[#allocation2] sm:$0xf] (%p259_p0) }
  0xac   : > { %258 = vst.msk [vmem:[#allocation3] sm:$0xf] %vm242_vm2, %v257_v18  ;;  %v265_v21 = vmul.f32 (%p259_p0), 0.001953125, %v264_v19 }
  0xae   : > { %v268_v23 = vmul.f32 %v265_v21, %v265_v21 }
  0xb3   : > { %v266_v20 = vld [vmem:[#allocation3] sm:$0xf] }
  0xb4   : > { %v267_v22 = vmul.f32 0.001953125, %v266_v20 }
  0xb6   : > { %v269_v24 = vsub.f32 %v267_v22, %v268_v23 }
  0xb8   : > { %v270_v25 = vadd.f32 1e-05, %v269_v24 }
  0xba   : > { %416 = vrsqrt.f32 %v270_v25  ;;  %vm277_vm3 = vweird.f32 %v270_v25 }
  0xc0   : > { %v417_v26 = vpop.eup %416 }
  0xc1   : > { %v272_v27 = vmul.f32 %v417_v26, %v270_v25  ;;  %vm278_vm4 = vweird.f32 %v417_v26 }
  0xc2   : > { %vm279_vm5 = vmor %vm277_vm3, %vm278_vm4 }
  0xc3   : > { %v273_v28 = vmul.f32 %v417_v26, %v272_v27 }
  0xc5   : > { %v274_v29 = vmul.f32 0.5, %v273_v28 }
  0xc7   : > { %v275_v30 = vsub.f32 1.5, %v274_v29 }
  0xc9   : > { %v276_v31 = vmul.f32 %v417_v26, %v275_v30 }
  0xcb   : > { %v280_v33 = vsel %vm279_vm5, %v417_v26, %v276_v31 }
  0xcc   : > { %v282_v34 = vmul.f32 %v281_v32, %v280_v33 }
  0xce   : > { %283 = vst.msk [vmem:[%s632_s3] sm:$0xf] %vm242_vm2, %v282_v34  ;;  %v285_v36 = vmul.f32 %v282_v34, %v265_v21 }
  0xd0   : > { %v286_v37 = vsub.f32 %v284_v35, %v285_v36 }
  0xd2   : > { %287 = vst.msk [vmem:[%s633_s4] sm:$0xf] %vm242_vm2, %v286_v37 }
  0xd3 PF: > { %s18_s20 = sadd.s32 1, %s498_s20   ;;  %s636_s15 = smov %s482_s16 }
  0xd4   : > { %p15_p1 = scmp.ge.s32.totalorder %s18_s20, 4   ;;  %s637_s16 = smov %s486_s17 }
  0xd5   : > { %s638_s17 = smov %s575_s27  ;;  %s639_s18 = smov %s494_s19 }
  0xd6   : > { %s640_s19 = smov %s642_s22  ;;  %17 = sbr.rel (!%p15_p1) target bundleno = 4 (0x4), region = 84 }
  0xdb   :  { %305 = vsyncpa [#allocation5], 1 }
  0xdc   :  { %307 = vsyncpa [#allocation5 + $0x1], 1 }

</bundles_post_ra>
